<compile_context>
chip_gen: v7x
topology: tpu7x:2x2x1
jax: 0.10.0
libtpu: 0.0.40
codegen_flags: <defaults>
</compile_context>

<pallas_src>
import functools

import jax
import jax.numpy as jnp
from jax import lax
from jax.experimental import pallas as pl
from jax.experimental.pallas import tpu as pltpu

NUM_PARTICLES = 3      # cfg.num_particles (ens3)
NUM_CLASSES = 10       # CIFAR-10
NC_PAD = 128           # lane-dense class padding (single 128-lane group holds P*NC cols)
B_TILE = 128           # batch tile per grid step (keeps vreg pressure < 64 at f32)


# --------------------------------------------------------------------------------------
# Kernels
# --------------------------------------------------------------------------------------

def _mean_logits_kernel(x_ref, w_ref, b_ref, out_ref):
    """return_entropy=False fast path: x @ mean(W) + mean(b), one (D,128) bf16 slab.

    x_ref  : (Bt, D)    bf16
    w_ref  : (D, 128)   bf16  (particle-mean weights, zero-padded cols)
    b_ref  : (1, 128)   f32   (particle-mean bias, zero-padded cols)
    out_ref: (Bt, 128)  f32   (padded lanes are exactly 0 + 0 = 0)
    """
    out_ref[...] = (
        jnp.dot(x_ref[...], w_ref[...], preferred_element_type=jnp.float32)
        + b_ref[...])


def _ensemble_full_kernel(x_ref, w_ref, b_ref, out_ref, *,
                          num_particles, num_classes, nc_pad):
    """Fused ensemble forward (return_entropy=True path).

    x_ref  : (Bt, D)        bf16 input features
    w_ref  : (D, nc_pad)    bf16 packed weights: lane p*NC+c = particle p, class c
    b_ref  : (1, nc_pad)    f32  packed biases (zero-padded)
    out_ref: (Bt, 4*nc_pad) f32  [mean_logits | mean_soft | std_soft | mean_entropy(bcast)]
    """
    P, NC = num_particles, num_classes
    inv_p = 1.0 / float(P)

    # One MXU matmul for all particles at once (bf16 in, f32 accumulate).
    logits = jnp.dot(x_ref[...], w_ref[...], preferred_element_type=jnp.float32)
    logits = logits + b_ref[...]                               # (Bt, 128), valid lanes [0, P*NC)

    lane = lax.broadcasted_iota(jnp.int32, logits.shape, 1)
    valid = lane < P * NC

    # Per-particle segmented softmax via disjoint lane masks (VPU selects, full-128 reductions).
    s_all = jnp.zeros_like(logits)                             # packed per-particle softmax
    sum_ent = jnp.zeros((logits.shape[0], 1), jnp.float32)
    for p in range(P):                                         # static tiny loop
        seg = (lane >= p * NC) & (lane < (p + 1) * NC)
        m = jnp.max(jnp.where(seg, logits, -jnp.inf), axis=1, keepdims=True)
        lm = jnp.where(seg, logits - m, 0.0)                   # masked shifted logits (<= 0)
        e = jnp.where(seg, jnp.exp(lm), 0.0)
        denom = jnp.sum(e, axis=1, keepdims=True)
        inv = pl.reciprocal(denom, approx=True)                # EUP slot
        inv = inv * (2.0 - denom * inv)                        # one Newton step -> f32 accuracy
        s = e * inv
        s_all = s_all + s                                      # disjoint lanes -> placement
        # entropy identity: -sum_c s*log(s) = log(denom) - sum_c s*(l - m)
        # (single (Bt,1) EUP log per particle; ~1e-7 from the reference's log(s+1e-8))
        sum_ent = sum_ent + (jnp.log(denom)
                             - jnp.sum(s * lm, axis=1, keepdims=True))

    # Cross-particle alignment (lane p*NC+c -> lane c) via tiny selector matmuls on the
    # otherwise-idle MXU; avoids non-128-aligned lane slicing / XLU rotates.
    r = lax.broadcasted_iota(jnp.int32, (nc_pad, nc_pad), 0)
    c = lax.broadcasted_iota(jnp.int32, (nc_pad, nc_pad), 1)
    gather = (r == c)
    scatter = (c == r)
    for p in range(1, P):
        gather = gather | (r == c + p * NC)
        scatter = scatter | (c == r + p * NC)
    s_gather = (gather & (c < NC)).astype(jnp.float32)         # [p*NC+cls, cls] = 1
    s_scatter = (scatter & (r < NC)).astype(jnp.float32)       # [cls, p*NC+cls] = 1

    logits_v = jnp.where(valid, logits, 0.0)
    mean_l = jnp.dot(logits_v, s_gather, preferred_element_type=jnp.float32) * inv_p
    mean_s = jnp.dot(s_all, s_gather, preferred_element_type=jnp.float32) * inv_p

    # centered (two-pass) unbiased variance across particles (torch.std default, ddof=1)
    mean_packed = jnp.dot(mean_s, s_scatter, preferred_element_type=jnp.float32)
    d = jnp.where(valid, s_all - mean_packed, 0.0)
    if P > 1:
        var = jnp.dot(d * d, s_gather,
                      preferred_element_type=jnp.float32) * (1.0 / float(P - 1))
    else:
        var = jnp.zeros_like(mean_s)
    std = jnp.sqrt(var)

    ent_b = jnp.broadcast_to(sum_ent * inv_p, mean_s.shape)    # lane-dense broadcast

    # lane-aligned, unmasked 128-wide stores into one dense output slab
    out_ref[:, 0 * nc_pad:1 * nc_pad] = mean_l
    out_ref[:, 1 * nc_pad:2 * nc_pad] = mean_s
    out_ref[:, 2 * nc_pad:3 * nc_pad] = std
    out_ref[:, 3 * nc_pad:4 * nc_pad] = ent_b


# --------------------------------------------------------------------------------------
# Wrapper
# --------------------------------------------------------------------------------------

def pack_bayeswrap_params(W, b):
    """Pack per-particle params ONCE (hoisted out of the forward path).

    W: (P, D, NC) f32, b: (P, 1, NC) f32.
    Returns cached slabs:
      w_full : (D, 128) bf16 — all P*NC class columns in one 128-lane group, zero-padded
      b_full : (1, 128) f32  — matching biases, zero-padded (masking done in-kernel)
      w_mean : (D, 128) bf16 — particle-mean weights (return_entropy=False fast path)
      b_mean : (1, 128) f32  — particle-mean bias
    """
    P, D, NC = W.shape
    assert P * NC <= NC_PAD, "all particle class columns must fit one 128-lane group"

    w_cat = jnp.transpose(W, (1, 0, 2)).reshape(D, P * NC)          # [d, p*NC+c] = W[p,d,c]
    w_full = jnp.pad(w_cat, ((0, 0), (0, NC_PAD - P * NC))).astype(jnp.bfloat16)
    b_full = jnp.pad(b.reshape(1, P * NC),
                     ((0, 0), (0, NC_PAD - P * NC))).astype(jnp.float32)

    w_mean = jnp.pad(W.mean(0), ((0, 0), (0, NC_PAD - NC))).astype(jnp.bfloat16)
    b_mean = jnp.pad(b.mean(0).reshape(1, NC),
                     ((0, 0), (0, NC_PAD - NC))).astype(jnp.float32)

    return dict(w_full=w_full, b_full=b_full, w_mean=w_mean, b_mean=b_mean,
                num_particles=P, num_classes=NC)


def _batch_tiling(B):
    """Choose (tile, padded_B, num_tiles) for the 'parallel' batch grid axis."""
    if B <= B_TILE:
        return B, B, 1           # single tile == full array -> no (8,128) constraint issue
    n = pl.cdiv(B, B_TILE)
    return B_TILE, n * B_TILE, n


def bayeswrap_forward(x_nchw, params, *, return_entropy=False):
    """BayesWrap.forward.

    x_nchw: (B, C, H, W) float32 ; params: output of pack_bayeswrap_params (cached).
    """
    B = x_nchw.shape[0]
    D = x_nchw.shape[1] * x_nchw.shape[2] * x_nchw.shape[3]
    P = params["num_particles"]
    NC = params["num_classes"]

    x = x_nchw.reshape(B, D).astype(jnp.bfloat16)        # bf16 activations, f32 accumulate
    bt, bp, ntiles = _batch_tiling(B)
    if bp != B:
        x = jnp.pad(x, ((0, bp - B), (0, 0)))            # zero rows -> harmless softmax

    grid = (ntiles,)
    cparams = pltpu.CompilerParams(dimension_semantics=("parallel",))
    # Weight/bias index_maps are constant across the grid -> fetched once, not per step.
    w_spec = pl.BlockSpec((D, NC_PAD), lambda i: (0, 0))
    b_spec = pl.BlockSpec((1, NC_PAD), lambda i: (0, 0))
    x_spec = pl.BlockSpec((bt, D), lambda i: (i, 0))

    if not return_entropy:
        out = pl.pallas_call(
            _mean_logits_kernel,
            out_shape=jax.ShapeDtypeStruct((bp, NC_PAD), jnp.float32),
            grid=grid,
            in_specs=[x_spec, w_spec, b_spec],
            out_specs=pl.BlockSpec((bt, NC_PAD), lambda i: (i, 0)),
            compiler_params=cparams,
        )(x, params["w_mean"], params["b_mean"])
        return out[:B, :NC]

    kernel = functools.partial(_ensemble_full_kernel, num_particles=P,
                               num_classes=NC, nc_pad=NC_PAD)
    out = pl.pallas_call(
        kernel,
        out_shape=jax.ShapeDtypeStruct((bp, 4 * NC_PAD), jnp.float32),
        grid=grid,
        in_specs=[x_spec, w_spec, b_spec],
        out_specs=pl.BlockSpec((bt, 4 * NC_PAD), lambda i: (i, 0)),
        compiler_params=cparams,
    )(x, params["w_full"], params["b_full"])

    logits = out[:B, 0:NC]
    soft_out = out[:B, NC_PAD:NC_PAD + NC]
    stds = out[:B, 2 * NC_PAD:2 * NC_PAD + NC]
    entropies = out[:B, 3 * NC_PAD]
    return logits, entropies, soft_out, stds


# --------------------------------------------------------------------------------------
# Reference + demo
# --------------------------------------------------------------------------------------

def _reference_forward(x_nchw, W, b):
    """Pure-JAX reference mirroring the PyTorch BayesWrap.forward (full f32)."""
    B = x_nchw.shape[0]
    x = x_nchw.reshape(B, -1)
    per_logits = jnp.einsum("bd,pdn->pbn", x, W,
                            precision=jax.lax.Precision.HIGHEST) + b     # (P, B, NC)
    per_soft = jax.nn.softmax(per_logits, axis=-1)
    ent = jnp.sum(-per_soft * jnp.log(per_soft + 1e-8), axis=-1)         # (P, B)
    logits = per_logits.mean(0)
    soft = per_soft.mean(0)
    stds = jnp.std(per_soft, axis=0, ddof=1)
    entropies = ent.mean(0)
    return logits, entropies, soft, stds


def _init_particles(key, num_particles, D, num_classes):
    """Deterministic per-particle init (xavier_uniform-style weights, bias=0.01)."""
    Ws, bs = [], []
    bound = jnp.sqrt(6.0 / (D + num_classes))
    for i in range(num_particles):
        k = jax.random.fold_in(key, i)
        Ws.append(jax.random.uniform(k, (D, num_classes), jnp.float32,
                                     minval=-bound, maxval=bound))
        bs.append(jnp.full((1, num_classes), 0.01, jnp.float32))
    return jnp.stack(Ws), jnp.stack(bs)


if __name__ == "__main__":
    key = jax.random.PRNGKey(0)
    kx, kw = jax.random.split(key)

    B, C, H, Wdim = 2, 4, 16, 16
    D = C * H * Wdim

    x = jax.random.normal(kx, (B, C, H, Wdim), jnp.float32)
    W, b = _init_particles(kw, NUM_PARTICLES, D, NUM_CLASSES)

    # Pack ONCE (in training this happens per weight update, not per forward).
    params = pack_bayeswrap_params(W, b)

    # default forward (return_entropy=False) -> mean logits (mean-weight fast path)
    logits_fast = bayeswrap_forward(x, params, return_entropy=False)
    jax.block_until_ready(logits_fast)

    # full return path (return_entropy=True)
    logits_full, entropies, soft_out, stds = bayeswrap_forward(
        x, params, return_entropy=True)
    jax.block_until_ready((logits_full, entropies, soft_out, stds))

    # ---- correctness checks ------------------------------------------------------
    # The kernel uses bf16 activations/weights (f32 accumulate), so the reference is
    # evaluated on the identically bf16-rounded inputs.
    x_bf = x.astype(jnp.bfloat16).astype(jnp.float32)
    W_bf = W.astype(jnp.bfloat16).astype(jnp.float32)
    r_logits, r_ent, r_soft, r_std = _reference_forward(x_bf, W_bf, b)

    assert jnp.allclose(logits_full, r_logits, atol=1e-4, rtol=1e-4)
    assert jnp.allclose(entropies, r_ent, atol=1e-4, rtol=1e-4)
    assert jnp.allclose(soft_out, r_soft, atol=1e-4, rtol=1e-4)
    assert jnp.allclose(stds, r_std, atol=1e-4, rtol=1e-4)

    # Fast path: exact check against the same-math reference (x_bf16 @ bf16(mean W)) ...
    wm_bf = W.mean(0).astype(jnp.bfloat16).astype(jnp.float32)
    fast_ref = jnp.dot(x_bf.reshape(B, -1), wm_bf,
                       precision=jax.lax.Precision.HIGHEST) + b.mean(0)
    assert jnp.allclose(logits_fast, fast_ref, atol=1e-4, rtol=1e-4)
    # ... and a looser check vs the per-particle reference (mean-of-weights folding is
    # exact in real arithmetic; the small delta is bf16 rounding reassociation).
    assert jnp.allclose(logits_fast, r_logits, atol=5e-2, rtol=5e-2)

    print("KERNEL_OK")
</pallas_src>

<mosaic_0001>
module attributes {stable_mosaic.version = 11 : i64} {
  func.func @_mean_logits_kernel(%arg0: i32, %arg1: memref<2x1024xbf16, #tpu.memory_space<vmem>>, %arg2: memref<1024x128xbf16, #tpu.memory_space<vmem>>, %arg3: memref<1x128xf32, #tpu.memory_space<vmem>>, %arg4: memref<2x128xf32, #tpu.memory_space<vmem>>) attributes {dimension_semantics = [#tpu.dimension_semantics<parallel>], iteration_bounds = array<i64: 1>, scalar_prefetch = 0 : i64, scratch_operands = 0 : i64, tpu.core_type = #tpu.core_type<tc>, window_params = [{transform_indices = @transform_0, window_bounds = array<i64: 2, 1024>}, {pipeline_mode = #tpu.pipeline_mode<synchronous>, transform_indices = @transform_1, window_bounds = array<i64: 1024, 128>}, {pipeline_mode = #tpu.pipeline_mode<synchronous>, transform_indices = @transform_2, window_bounds = array<i64: 1, 128>}, {transform_indices = @transform_3, window_bounds = array<i64: 2, 128>}]} {
    %c0 = arith.constant 0 : index
    %c0_0 = arith.constant 0 : index
    %0 = vector.load %arg1[%c0, %c0_0] : memref<2x1024xbf16, #tpu.memory_space<vmem>>, vector<2x1024xbf16>
    %c0_1 = arith.constant 0 : index
    %c0_2 = arith.constant 0 : index
    %1 = vector.load %arg2[%c0_1, %c0_2] : memref<1024x128xbf16, #tpu.memory_space<vmem>>, vector<1024x128xbf16>
    %cst = arith.constant dense<0.000000e+00> : vector<2x128xf32>
    %2 = tpu.matmul %0, %1, %cst {dimension_numbers = #tpu.dot_dimension_numbers<[1], [0], [0], [1], [0, 0, 1, 1], [], []>} : vector<2x1024xbf16>, vector<1024x128xbf16>, vector<2x128xf32> -> vector<2x128xf32>
    %c0_3 = arith.constant 0 : index
    %c0_4 = arith.constant 0 : index
    %3 = vector.load %arg3[%c0_3, %c0_4] : memref<1x128xf32, #tpu.memory_space<vmem>>, vector<1x128xf32>
    %4 = vector.broadcast %3 : vector<1x128xf32> to vector<2x128xf32>
    %5 = arith.addf %2, %4 : vector<2x128xf32>
    %c0_5 = arith.constant 0 : index
    %c0_6 = arith.constant 0 : index
    %6 = vector.load %arg4[%c0_5, %c0_6] : memref<2x128xf32, #tpu.memory_space<vmem>>, vector<2x128xf32>
    tpu.vector_store %arg4[%c0_5, %c0_6], %5 {strides = array<i32>} : memref<2x128xf32, #tpu.memory_space<vmem>>, vector<2x128xf32>,
    return
  }
  func.func @transform_0(%arg0: i32) -> (i32, i32) {
    %c0_i32 = arith.constant 0 : i32
    %c0_i32_0 = arith.constant 0 : i32
    return %arg0, %c0_i32 : i32, i32
  }
  func.func @transform_1(%arg0: i32) -> (i32, i32) {
    %c0_i32 = arith.constant 0 : i32
    %c0_i32_0 = arith.constant 0 : i32
    %c0_i32_1 = arith.constant 0 : i32
    return %c0_i32, %c0_i32_0 : i32, i32
  }
  func.func @transform_2(%arg0: i32) -> (i32, i32) {
    %c0_i32 = arith.constant 0 : i32
    %c0_i32_0 = arith.constant 0 : i32
    %c0_i32_1 = arith.constant 0 : i32
    return %c0_i32, %c0_i32_0 : i32, i32
  }
  func.func @transform_3(%arg0: i32) -> (i32, i32) {
    %c0_i32 = arith.constant 0 : i32
    %c0_i32_0 = arith.constant 0 : i32
    return %arg0, %c0_i32 : i32, i32
  }
}

</mosaic_0001>

<bundles_post_ra>
// kernel: tpu_custom_call.1
= control target key start
LH: loop header
LB: loop body
LE: loop exit
PB: predicated region body
PF: predicated region fallthrough
CT: control target
= control target key end

     0   :  { %8 = vsyncpa [#allocation3], 0  ;;  %s1178_s0 = inlined_call_operand.hbm [shape: bf16[2,1024], index: 0, kind: input, shape index: {}]   ;;  %s1179_s1 = inlined_call_operand.hbm [shape: bf16[1024,128], index: 1, kind: input, shape index: {}]   ;;  %s1180_s2 = inlined_call_operand.vmem [shape: f32[1,128], index: 2, kind: input, shape index: {}]   ;;  %s1181_s3 = inlined_call_operand.hbm [shape: f32[2,128], index: 3, kind: output, shape index: {}]  }
   0x1   :  { %9 = vsyncpa [#allocation6], 0 }
   0x2   :  { %10 = vsyncpa [#allocation4], 0  ;;  %s1093_s12 = smov [#allocation2]   ;;  %s1094_s14 = smov [#allocation5]  }
   0x3   :  { %s17_s13 = sshll.u32 %s1093_s12, 4  ;;  %s26_s15 = sshll.u32 %s1094_s14, 4  ;;  %s18_s13 = int_to_ptr.vmem [resolvable:$true] %s17_s13  ;;  %s1119_s15 = int_to_ptr.vmem [resolvable:$true] %s26_s15 }
   0x4   :  { %s1021_s18 = scalar_lea.hbm %s1178_s0, 128 }
   0x5   :  { %p1022_p0 = scmp.ne.s32.totalorder %s1178_s0, %s1021_s18  ;;  %p1025_p1 = scmp.lt.u32.totalorder %s1021_s18, %s1178_s0 }
   0x7   :  { %p1027_p2 = pnand %p1025_p1, %p1022_p0 }
   0x9   :  { %1030 = shalt.err (!%p1027_p2)
}
   0xa   :  { %s1031_s23 = scalar_lea.vmem %s18_s13, 128  ;;  %p1036_p4 = scmp.lt.s32.totalorder %s18_s13, %s18_s13 }
   0xb   :  { %p1032_p3 = scmp.ne.s32.totalorder %s18_s13, %s1031_s23  ;;  %p1037_p5 = scmp.lt.s32.totalorder %s1031_s23, %s1031_s23 }
   0xd   :  { %p1038_p6 = por %p1037_p5, %p1036_p4 }
   0xf   :  { %p1039_p7 = pnand %p1038_p6, %p1032_p3 }
  0x11   :  { %1042 = shalt.err (!%p1039_p7)
}
  0x12   :  { %20 = dma.hbm_to_vmem [thread:$0]  %s1178_s0, 128, %s18_s13, [#allocation3]  }
  0x13   :  { %s1043_s28 = scalar_lea.hbm %s1179_s1, 8192 }
  0x14   :  { %p1044_p8 = scmp.ne.s32.totalorder %s1179_s1, %s1043_s28  ;;  %p1047_p9 = scmp.lt.u32.totalorder %s1043_s28, %s1179_s1 }
  0x16   :  { %p1049_p10 = pnand %p1047_p9, %p1044_p8 }
  0x18   :  { %1052 = shalt.err (!%p1049_p10)
}
  0x19   :  { %s1053_s6 = scalar_lea.vmem %s1119_s15, 8192  ;;  %p1058_p12 = scmp.lt.s32.totalorder %s1119_s15, %s1119_s15 }
  0x1a   :  { %p1054_p11 = scmp.ne.s32.totalorder %s1119_s15, %s1053_s6  ;;  %p1059_p13 = scmp.lt.s32.totalorder %s1053_s6, %s1053_s6 }
  0x1c   :  { %p1060_p0 = por %p1059_p13, %p1058_p12 }
  0x1e   :  { %p1061_p1 = pnand %p1060_p0, %p1054_p11 }
  0x20   :  { %1064 = shalt.err (!%p1061_p1)
}
  0x21   :  { %s1095_s0 = smov 64   ;;  %s1096_s7 = smov 4  }
  0x22   :  { %32 = dma.hbm_to_vmem [thread:$0]  %s1179_s1, 8192, %s1119_s15, [#allocation6], %s1095_s0, %s1095_s0, %s1096_s7  }
  0x23   :  { %1087 = dma.done.wait [#allocation3], 128  }
  0x24   :  { %1088 = vsyncadd [#allocation3], 4294967168 }
  0x25   :  { %1089 = dma.done.wait [#allocation6], 8192  }
  0x26   :  { %1090 = vsyncadd [#allocation6], 4294959104  ;;  %v956_v0 = vld [vmem:[#allocation5 + $0x40] sm:$0xff]   ;;  %v960_v4 = vld [vmem:[#allocation5 + $0x48] sm:$0xff]   ;;  %v1097_v22 = vmov 1966171168   ;;  %v183_v24 = vlaneseq }
  0x27   :  { %v957_v1 = vld [vmem:[#allocation5 + $0xc0] sm:$0xff]   ;;  %862 = vmatprep.subr.bf16.mxu0 %v956_v0  ;;  %v961_v5 = vld [vmem:[#allocation5 + $0xc8] sm:$0xff]   ;;  %v964_v8 = vld [vmem:[#allocation5 + $0x50] sm:$0xff]   ;;  %v181_v23 = vunpack.c.l.s4 %v1097_v22  ;;  %s1098_s11 = smov [#allocation7]  }
  0x28   :  { %v958_v2 = vld [vmem:[#allocation5] sm:$0xff]   ;;  %884 = vmatprep.subr.bf16.mxu1 %v957_v1  ;;  %v962_v6 = vld [vmem:[#allocation5 + $0x8] sm:$0xff]   ;;  %v965_v9 = vld [vmem:[#allocation5 + $0xd0] sm:$0xff]   ;;  %v184_v30 = vshrl.u32 %v183_v24, 7 }
  0x29   :  { %v959_v3 = vld [vmem:[#allocation5 + $0x80] sm:$0xff]   ;;  %863 = vmatpush3.bf16.msra.mxu0 %v958_v2  ;;  %v963_v7 = vld [vmem:[#allocation5 + $0x88] sm:$0xff]   ;;  %v966_v10 = vld [vmem:[#allocation5 + $0x10] sm:$0xff]   ;;  %v182_v29 = vunpack.c.0.s8 %v181_v23 }
  0x2a   :  { %885 = vmatpush3.bf16.msra.mxu1 %v959_v3  ;;  %864 = vmatprep.subr.bf16.mxu0 %v960_v4  ;;  %v967_v11 = vld [vmem:[#allocation5 + $0x90] sm:$0xff]   ;;  %v968_v12 = vld [vmem:[#allocation5 + $0x58] sm:$0xff]   ;;  %v972_v16 = vld [vmem:[#allocation5 + $0x60] sm:$0xff]  }
  0x2b   :  { %886 = vmatprep.subr.bf16.mxu1 %v961_v5  ;;  %v969_v13 = vld [vmem:[#allocation5 + $0xd8] sm:$0xff]   ;;  %v973_v17 = vld [vmem:[#allocation5 + $0xe0] sm:$0xff]   ;;  %v976_v20 = vld [vmem:[#allocation5 + $0x68] sm:$0xff]   ;;  %v1150_v35 = vsub.s32 %v182_v29, %v184_v30 }
  0x2c   :  { %v970_v14 = vld [vmem:[#allocation5 + $0x18] sm:$0xff]   ;;  %v974_v18 = vld [vmem:[#allocation5 + $0x20] sm:$0xff]   ;;  %v977_v21 = vld [vmem:[#allocation5 + $0xe8] sm:$0xff]  }
  0x2d   :  { %865 = vmatpush3.bf16.msra.mxu0 %v962_v6  ;;  %v971_v15 = vld [vmem:[#allocation5 + $0x98] sm:$0xff]   ;;  %v975_v19 = vld [vmem:[#allocation5 + $0xa0] sm:$0xff]   ;;  %v978_v25 = vld [vmem:[#allocation5 + $0x28] sm:$0xff]  }
  0x2e   :  { %887 = vmatpush3.bf16.msra.mxu1 %v963_v7  ;;  %866 = vmatprep.subr.bf16.mxu0 %v964_v8  ;;  %v979_v26 = vld [vmem:[#allocation5 + $0xa8] sm:$0xff]   ;;  %v980_v27 = vld [vmem:[#allocation5 + $0x70] sm:$0xff]   ;;  %v984_v33 = vld [vmem:[#allocation5 + $0x78] sm:$0xff]  }
  0x2f   :  { %888 = vmatprep.subr.bf16.mxu1 %v965_v9  ;;  %v981_v28 = vld [vmem:[#allocation5 + $0xf0] sm:$0xff]   ;;  %v985_v34 = vld [vmem:[#allocation5 + $0xf8] sm:$0xff]   ;;  %v989_v41 = vld [vmem:[#allocation5 + $0x140] sm:$0xff]  }
  0x30   :  { %v982_v31 = vld [vmem:[#allocation5 + $0x30] sm:$0xff]   ;;  %v986_v36 = vld [vmem:[#allocation5 + $0x38] sm:$0xff]   ;;  %v990_v42 = vld [vmem:[#allocation5 + $0x1c0] sm:$0xff]  }
  0x31   :  { %867 = vmatpush3.bf16.msra.mxu0 %v966_v10  ;;  %v983_v32 = vld [vmem:[#allocation5 + $0xb0] sm:$0xff]   ;;  %v987_v37 = vld [vmem:[#allocation5 + $0xb8] sm:$0xff]   ;;  %v991_v47 = vld [vmem:[#allocation5 + $0x100] sm:$0xff]  }
  0x32   :  { %889 = vmatpush3.bf16.msra.mxu1 %v967_v11  ;;  %868 = vmatprep.subr.bf16.mxu0 %v968_v12  ;;  %v42_v38 = vld [vmem:[#allocation2] sm:$0xff]  ;;  %v993_v50 = vld [vmem:[#allocation5 + $0x148] sm:$0xff]   ;;  %v992_v52 = vld [vmem:[#allocation5 + $0x180] sm:$0xff]  }
  0x33   :  { %890 = vmatprep.subr.bf16.mxu1 %v969_v13  ;;  %v179_v39 = vcombine.high %v42_v38, %v42_v38  ;;  %v186_v40 = vrot.slane %v42_v38, %v1150_v35  ;;  %v994_v54 = vld [vmem:[#allocation5 + $0x1c8] sm:$0xff]   ;;  %v997_v57 = vld [vmem:[#allocation5 + $0x150] sm:$0xff]   ;;  %v1001_v61 = vld [vmem:[#allocation5 + $0x158] sm:$0xff]  }
  0x34   :  { %v995_v55 = vld [vmem:[#allocation5 + $0x108] sm:$0xff]   ;;  %v998_v59 = vld [vmem:[#allocation5 + $0x1d0] sm:$0xff]   ;;  %v1002_v63 = vld [vmem:[#allocation5 + $0x1d8] sm:$0xff]  }
  0x35   :  { %869 = vmatpush3.bf16.msra.mxu0 %v970_v14  ;;  %v194_v43 = vcombine.high %v186_v40, %v186_v40  ;;  %v202_v44 = vrot.slane %v186_v40, %v1150_v35  ;;  %v1155_v45 = vrot.slane %v179_v39, %v1150_v35  ;;  %v996_v58 = vld [vmem:[#allocation5 + $0x188] sm:$0xff]   ;;  %v999_v60 = vld [vmem:[#allocation5 + $0x110] sm:$0xff]   ;;  %v1003_v0 = vld [vmem:[#allocation5 + $0x118] sm:$0xff]  }
  0x36   :  { %891 = vmatpush3.bf16.msra.mxu1 %v971_v15  ;;  %870 = vmatprep.subr.bf16.mxu0 %v972_v16  ;;  %v1000_v62 = vld [vmem:[#allocation5 + $0x190] sm:$0xff]   ;;  %v1005_v1 = vld [vmem:[#allocation5 + $0x160] sm:$0xff]   ;;  %v1004_v2 = vld [vmem:[#allocation5 + $0x198] sm:$0xff]  }
  0x37   :  { %892 = vmatprep.subr.bf16.mxu1 %v973_v17  ;;  %v216_v46 = vrot.slane %v194_v43, %v1150_v35  ;;  %v195_v48 = vcombine.high %v1155_v45, %v1155_v45  ;;  %v224_v49 = vcombine.high %v202_v44, %v202_v44  ;;  %v1006_v3 = vld [vmem:[#allocation5 + $0x1e0] sm:$0xff]   ;;  %v1009_v5 = vld [vmem:[#allocation5 + $0x168] sm:$0xff]   ;;  %v1013_v9 = vld [vmem:[#allocation5 + $0x170] sm:$0xff]   ;;  %v209_v17 = vrot.slane %v1155_v45, %v1150_v35 }
  0x38   :  { %v1007_v4 = vld [vmem:[#allocation5 + $0x120] sm:$0xff]   ;;  %v1010_v7 = vld [vmem:[#allocation5 + $0x1e8] sm:$0xff]   ;;  %v1014_v11 = vld [vmem:[#allocation5 + $0x1f0] sm:$0xff]  }
  0x39   :  { %871 = vmatpush3.bf16.msra.mxu0 %v974_v18  ;;  %652 = vmatprep.mubr.bf16.mxu0 %v216_v46  ;;  %v226_v51 = vcombine.high %v216_v46, %v216_v46  ;;  %v223_v53 = vrot.slane %v195_v48, %v1150_v35  ;;  %v1008_v6 = vld [vmem:[#allocation5 + $0x1a0] sm:$0xff]   ;;  %v1011_v8 = vld [vmem:[#allocation5 + $0x128] sm:$0xff]   ;;  %v1015_v12 = vld [vmem:[#allocation5 + $0x130] sm:$0xff]  }
  0x3a   :  { %893 = vmatpush3.bf16.msra.mxu1 %v975_v19  ;;  %872 = vmatprep.subr.bf16.mxu0 %v976_v20  ;;  %v1012_v10 = vld [vmem:[#allocation5 + $0x1a8] sm:$0xff]   ;;  %v1017_v13 = vld [vmem:[#allocation5 + $0x178] sm:$0xff]   ;;  %v1016_v14 = vld [vmem:[#allocation5 + $0x1b0] sm:$0xff]   ;;  %v225_v19 = vcombine.high %v209_v17, %v209_v17 }
  0x3b   :  { %894 = vmatprep.subr.bf16.mxu1 %v977_v21  ;;  %692 = vmatprep.mubr.bf16.mxu1 %v226_v51  ;;  %v227_v56 = vcombine.high %v223_v53, %v223_v53  ;;  %v1018_v15 = vld [vmem:[#allocation5 + $0x1f8] sm:$0xff]  }
  0x3c   :  { %v1019_v16 = vld [vmem:[#allocation5 + $0x138] sm:$0xff]  }
  0x3d   :  { %873 = vmatpush3.bf16.msra.mxu0 %v978_v25  ;;  %v1020_v18 = vld [vmem:[#allocation5 + $0x1b8] sm:$0xff]  }
  0x3e   :  { %895 = vmatpush3.bf16.msra.mxu1 %v979_v26  ;;  %874 = vmatprep.subr.bf16.mxu0 %v980_v27  ;;  %v797_v21 = vld [vmem:[%s1180_s2] ss:$0 sm:$0xff]  ;;  %s787_s2 = sshll.u32 %s1098_s11, 4  ;;  %s788_s2 = int_to_ptr.vmem [resolvable:$true] %s787_s2 }
  0x3f   :  { %896 = vmatprep.subr.bf16.mxu1 %v981_v28  ;;  %s1065_s12 = scalar_lea.vmem %s788_s2, 32  ;;  %p1070_p3 = scmp.lt.s32.totalorder %s788_s2, %s788_s2 }
  0x40   :  { %p1066_p2 = scmp.ne.s32.totalorder %s788_s2, %s1065_s12  ;;  %p1071_p4 = scmp.lt.s32.totalorder %s1065_s12, %s1065_s12 }
  0x41   :  { %875 = vmatpush3.bf16.msra.mxu0 %v982_v31 }
  0x42   :  { %897 = vmatpush3.bf16.msra.mxu1 %v983_v32  ;;  %876 = vmatprep.subr.bf16.mxu0 %v984_v33  ;;  %p1072_p5 = por %p1071_p4, %p1070_p3 }
  0x43   :  { %898 = vmatprep.subr.bf16.mxu1 %v985_v34 }
  0x44   :  { %p1073_p6 = pnand %p1072_p5, %p1066_p2 }
  0x45   :  { %877 = vmatpush3.bf16.msra.mxu0 %v986_v36 }
  0x46   :  { %899 = vmatpush3.bf16.msra.mxu1 %v987_v37  ;;  %906 = vmatprep.subr.bf16.mxu0 %v989_v41 }
  0x47   :  { %928 = vmatprep.subr.bf16.mxu1 %v990_v42 }
  0x48   :  { %653 = vmatmul.mubr.bf16.vlgmr.msra.gmra.mrb[0].mxu0 %v202_v44 }
  0x49   :  { %907 = vmatpush3.bf16.msra.mxu0 %v991_v47  ;;  %693 = vmatmul.mubr.bf16.vlgmr.msra.gmra.mrb[0].mxu1 %v224_v49 }
  0x4a   :  { %908 = vmatprep.subr.bf16.mxu0 %v993_v50  ;;  %929 = vmatpush3.bf16.msra.mxu1 %v992_v52 }
  0x4b   :  { %732 = vmatprep.mubr.bf16.mxu0 %v223_v53  ;;  %930 = vmatprep.subr.bf16.mxu1 %v994_v54 }
  0x4c   :  { %772 = vmatprep.mubr.bf16.mxu1 %v227_v56 }
  0x4d   :  { %909 = vmatpush3.bf16.msra.mxu0 %v995_v55 }
  0x4e   :  { %910 = vmatprep.subr.bf16.mxu0 %v997_v57  ;;  %931 = vmatpush3.bf16.msra.mxu1 %v996_v58 }
  0x4f   :  { %932 = vmatprep.subr.bf16.mxu1 %v998_v59 }
  0x51   :  { %911 = vmatpush3.bf16.msra.mxu0 %v999_v60 }
  0x52   :  { %912 = vmatprep.subr.bf16.mxu0 %v1001_v61  ;;  %933 = vmatpush3.bf16.msra.mxu1 %v1000_v62 }
  0x53   :  { %934 = vmatprep.subr.bf16.mxu1 %v1002_v63 }
  0x55   :  { %913 = vmatpush3.bf16.msra.mxu0 %v1003_v0 }
  0x56   :  { %914 = vmatprep.subr.bf16.mxu0 %v1005_v1  ;;  %935 = vmatpush3.bf16.msra.mxu1 %v1004_v2 }
  0x57   :  { %936 = vmatprep.subr.bf16.mxu1 %v1006_v3 }
  0x59   :  { %915 = vmatpush3.bf16.msra.mxu0 %v1007_v4 }
  0x5a   :  { %916 = vmatprep.subr.bf16.mxu0 %v1009_v5  ;;  %937 = vmatpush3.bf16.msra.mxu1 %v1008_v6 }
  0x5b   :  { %938 = vmatprep.subr.bf16.mxu1 %v1010_v7 }
  0x5d   :  { %917 = vmatpush3.bf16.msra.mxu0 %v1011_v8 }
  0x5e   :  { %918 = vmatprep.subr.bf16.mxu0 %v1013_v9  ;;  %939 = vmatpush3.bf16.msra.mxu1 %v1012_v10 }
  0x5f   :  { %940 = vmatprep.subr.bf16.mxu1 %v1014_v11 }
  0x61   :  { %919 = vmatpush3.bf16.msra.mxu0 %v1015_v12 }
  0x62   :  { %920 = vmatprep.subr.bf16.mxu0 %v1017_v13  ;;  %941 = vmatpush3.bf16.msra.mxu1 %v1016_v14 }
  0x63   :  { %942 = vmatprep.subr.bf16.mxu1 %v1018_v15 }
  0x65   :  { %921 = vmatpush3.bf16.msra.mxu0 %v1019_v16 }
  0x66   :  { %943 = vmatpush3.bf16.msra.mxu1 %v1020_v18 }
  0x68   :  { %733 = vmatmul.mubr.bf16.vlgmr.msra.gmra.mrb[4].mxu0 %v209_v17 }
  0x69   :  { %773 = vmatmul.mubr.bf16.vlgmr.msra.gmra.mrb[4].mxu1 %v225_v19 }
 0x11b   :  { %v878_v20 = vpop.f32.mrb[0].mxu0 }
 0x11c   :  { %v879_v22 = vpop.f32.mrb[1].mxu0  ;;  %v900_v23 = vpop.f32.mrb[0].mxu1 }
 0x11d   :  { %v880_v24 = vadd.f32 %v879_v22, %v878_v20  ;;  %v881_v25 = vpop.f32.mrb[2].mxu0  ;;  %v901_v26 = vpop.f32.mrb[1].mxu1 }
 0x11e   :  { %v882_v27 = vpop.f32.mrb[3].mxu0  ;;  %v902_v29 = vadd.f32 %v901_v26, %v900_v23  ;;  %v903_v30 = vpop.f32.mrb[2].mxu1 }
 0x11f   :  { %v655_v28 = vadd.f32 %v880_v24, %v797_v21  ;;  %v904_v31 = vpop.f32.mrb[3].mxu1 }
 0x121   :  { %v695_v32 = vadd.f32 %v902_v29, %v655_v28 }
 0x13b   :  { %v922_v33 = vpop.f32.mrb[4].mxu0 }
 0x13c   :  { %v923_v34 = vpop.f32.mrb[5].mxu0  ;;  %v944_v35 = vpop.f32.mrb[4].mxu1 }
 0x13d   :  { %v924_v36 = vadd.f32 %v923_v34, %v922_v33  ;;  %v925_v37 = vpop.f32.mrb[6].mxu0  ;;  %v945_v38 = vpop.f32.mrb[5].mxu1 }
 0x13e   :  { %v926_v39 = vpop.f32.mrb[7].mxu0  ;;  %v946_v41 = vadd.f32 %v945_v38, %v944_v35  ;;  %v947_v42 = vpop.f32.mrb[6].mxu1 }
 0x13f   :  { %v735_v40 = vadd.f32 %v924_v36, %v695_v32  ;;  %v948_v43 = vpop.f32.mrb[7].mxu1 }
 0x141   :  { %v775_v44 = vadd.f32 %v946_v41, %v735_v40 }
 0x143   :  { %780 = vst [vmem:[#allocation7] sm:$0x3] %v775_v44 }
 0x144   :  { %1076 = shalt.err (!%p1073_p6)
}
 0x145   :  { %s1077_s15 = scalar_lea.hbm %s1181_s3, 32 }
 0x146   :  { %p1078_p7 = scmp.ne.s32.totalorder %s1181_s3, %s1077_s15  ;;  %p1081_p8 = scmp.lt.u32.totalorder %s1077_s15, %s1181_s3 }
 0x148   :  { %p1083_p9 = pnand %p1081_p8, %p1078_p7 }
 0x14a   :  { %1086 = shalt.err (!%p1083_p9)
}
 0x14b   :  { %790 = dma.vmem_to_hbm [thread:$0]  %s788_s2, 32, %s1181_s3, [#allocation4]  }
 0x14c   :  { %1091 = dma.done.wait [#allocation4], 32  }
 0x14d   :  { %1092 = vsyncadd [#allocation4], 4294967264 }
 0x14e   :  { %794 = vsyncpa [#allocation3], 1 }
 0x14f   :  { %795 = vsyncpa [#allocation6], 1 }
 0x150   :  { %796 = vsyncpa [#allocation4], 1 }

</bundles_post_ra>
